<compile_context>
chip_gen: v7x
topology: tpu7x:2x2x1
jax: 0.10.0
libtpu: 0.0.40
codegen_flags: <defaults>
</compile_context>

<pallas_src>
import functools

import jax
import jax.numpy as jnp
import numpy as np
from jax.experimental import pallas as pl
from jax.experimental.pallas import tpu as pltpu

LN_EPS = 1e-5      # torch.nn.LayerNorm default
_LANE = 128


def _round_up(v, m):
    return ((v + m - 1) // m) * m


def _gelu_exact(x):
    # matches torch.nn.GELU() (erf formulation)
    return 0.5 * x * (1.0 + jax.lax.erf(x * 0.7071067811865475))


def _gelu_tanh(x):
    # EUP-friendly tanh approximation (slightly deviates from torch's erf GELU)
    return jax.nn.gelu(x, approximate=True)


def _const_spec(shape):
    """BlockSpec for an operand that is identical on every grid step (single-buffered)."""
    index_map = lambda i: (0,) * len(shape)
    try:
        return pl.BlockSpec(shape, index_map, pipeline_mode=pl.Buffered(1))
    except TypeError:  # older BlockSpec signature without pipeline_mode
        return pl.BlockSpec(shape, index_map)


def tsmlp_kernel(x_ref, gpre_ref, bpre_ref, win_ref, bin_ref,
                 gg_ref, bg_ref, wout_ref, bout_ref,
                 mlo_ref, mhi_ref, o_ref,
                 *, adim, dgate, d_pad, shift, compute_dtype, approx_gelu):
    gelu = _gelu_tanh if approx_gelu else _gelu_exact

    # ---- pre_norm: LayerNorm over the REAL adim channels (padded columns are zero) ----
    x = x_ref[...].astype(jnp.float32)
    inv_a = 1.0 / adim
    mu = jnp.sum(x, axis=-1, keepdims=True) * inv_a
    var = jnp.sum(x * x, axis=-1, keepdims=True) * inv_a - mu * mu
    xn = (x - mu) * jax.lax.rsqrt(var + LN_EPS) * gpre_ref[...] + bpre_ref[...]
    # (x dies here; the residual is re-read from x_ref at the end)

    # ---- proj_in (single fused matmul, bf16 operands, f32 accumulation) + GELU ----
    h = jnp.dot(xn.astype(compute_dtype), win_ref[...],
                preferred_element_type=jnp.float32) + bin_ref[...]
    res = gelu(h[:, :d_pad])       # 128-aligned lane slices of the f32 accumulator: free
    gate = gelu(h[:, d_pad:])

    # ---- TSGU LayerNorm over the REAL gate channels ----
    inv_d = 1.0 / dgate
    mug = jnp.sum(gate, axis=-1, keepdims=True) * inv_d
    varg = jnp.sum(gate * gate, axis=-1, keepdims=True) * inv_d - mug * mug
    gn = (gate - mug) * jax.lax.rsqrt(varg + LN_EPS) * gg_ref[...] + bg_ref[...]

    # ---- temporal shift on the fused rows: rolls + precomputed masks ----
    # Rows are Bb contiguous (padded) sequences; wrap-around / cross-sequence rows are exactly
    # the rows the masks zero out, so the rolls are safe.
    rows = gn.shape[0]
    g_down = pltpu.roll(gn, shift=shift, axis=0)          # g_down[r] = gn[r - shift]
    g_up = pltpu.roll(gn, shift=rows - shift, axis=0)     # g_up[r]   = gn[r + shift]
    gate_sh = g_down * mlo_ref[...] + g_up * mhi_ref[...]

    gated = gelu(gate_sh) * res                           # act(gate) * res

    # ---- proj_out (+ act_out = Identity) + outer residual ----
    out = jnp.dot(gated.astype(compute_dtype), wout_ref[...],
                  preferred_element_type=jnp.float32) + bout_ref[...]
    o_ref[...] = (x_ref[...].astype(jnp.float32) + out).astype(o_ref.dtype)


def tsmlp_block(x, params, shift_size=1, *, matmul_dtype=jnp.bfloat16,
                approx_gelu=False, rows_target=None):
    B, T, A = x.shape
    assert 0 < shift_size < T, "temporal shift requires 0 < shift_size < T"
    w_in = params["w_in"]                      # (A, E), already (in, out)
    E = w_in.shape[1]
    D = E // 2

    # ---- lane / sublane padding targets ----
    A_pad = _round_up(A, _LANE)
    D_pad = _round_up(D, _LANE)
    E_pad = 2 * D_pad
    sub = 16 if jnp.dtype(matmul_dtype).itemsize < 4 else 8
    T_pad = _round_up(T, sub)

    # ---- generation-aware budgets ----
    try:
        phys_vmem = int(getattr(pltpu.get_tpu_info(), "vmem_capacity_bytes", 64 * 2**20))
    except Exception:
        phys_vmem = 64 * 2**20                 # conservative fallback
    small_vmem = phys_vmem <= 64 * 2**20       # v7x-class
    if rows_target is None:
        rows_target = 256 if small_vmem else 512
    vmem_cap = (40 * 2**20) if small_vmem else (96 * 2**20)

    # ---- rows per grid step: Bb whole (padded) sequences, grid >= 2 steps when B >= 2 ----
    bb_cap = max(B // 2, 1)
    cands = [c for c in range(1, bb_cap + 1)
             if B % c == 0 and c * T_pad <= max(rows_target, T_pad)]
    Bb = max(cands) if cands else 1
    rows = Bb * T_pad
    grid = (B // Bb,)

    # ---- parameter prep: zero-pad to lane multiples, fuse res/gate halves of proj_in ----
    w_res = jnp.pad(w_in[:, :D], ((0, A_pad - A), (0, D_pad - D)))
    w_gat = jnp.pad(w_in[:, D:], ((0, A_pad - A), (0, D_pad - D)))
    w_in_p = jnp.concatenate([w_res, w_gat], axis=1).astype(matmul_dtype)   # (A_pad, E_pad)

    b_in = params["b_in"].reshape(1, E)
    b_in_p = jnp.concatenate(
        [jnp.pad(b_in[:, :D], ((0, 0), (0, D_pad - D))),
         jnp.pad(b_in[:, D:], ((0, 0), (0, D_pad - D)))], axis=1).astype(jnp.float32)

    g_pre = jnp.pad(params["g_pre"].reshape(1, A), ((0, 0), (0, A_pad - A))).astype(jnp.float32)
    b_pre = jnp.pad(params["b_pre"].reshape(1, A), ((0, 0), (0, A_pad - A))).astype(jnp.float32)
    g_g = jnp.pad(params["g_g"].reshape(1, D), ((0, 0), (0, D_pad - D))).astype(jnp.float32)
    b_g = jnp.pad(params["b_g"].reshape(1, D), ((0, 0), (0, D_pad - D))).astype(jnp.float32)
    w_out_p = jnp.pad(params["w_out"], ((0, D_pad - D), (0, A_pad - A))).astype(matmul_dtype)
    b_out_p = jnp.pad(params["b_out"].reshape(1, A), ((0, 0), (0, A_pad - A))).astype(jnp.float32)

    # padded input, (B*T_pad, A_pad), zero rows/cols in the pad region
    x_p = jnp.pad(x, ((0, 0), (0, T_pad - T), (0, A_pad - A))).reshape(B * T_pad, A_pad)

    # ---- hoisted temporal-shift masks (identical on every grid step) ----
    d2 = D // 2
    t = np.arange(T_pad)
    lane = np.arange(D_pad)
    lane_lo = lane < d2
    lane_hi = (lane >= d2) & (lane < D)
    valid_lo_t = (t >= shift_size) & (t < T)
    valid_hi_t = t < (T - shift_size)
    m_lo = jnp.asarray(np.tile(np.outer(valid_lo_t, lane_lo).astype(np.float32), (Bb, 1)))
    m_hi = jnp.asarray(np.tile(np.outer(valid_hi_t, lane_hi).astype(np.float32), (Bb, 1)))

    kernel = functools.partial(tsmlp_kernel, adim=A, dgate=D, d_pad=D_pad,
                               shift=shift_size, compute_dtype=matmul_dtype,
                               approx_gelu=approx_gelu)

    row_spec = pl.BlockSpec((rows, A_pad), lambda i: (i, 0))
    grid_spec = pltpu.PrefetchScalarGridSpec(
        num_scalar_prefetch=0,
        grid=grid,
        in_specs=[
            row_spec,                            # x rows
            _const_spec((1, A_pad)),             # pre_norm gamma
            _const_spec((1, A_pad)),             # pre_norm beta
            _const_spec((A_pad, E_pad)),         # proj_in weight (fused res|gate)
            _const_spec((1, E_pad)),             # proj_in bias
            _const_spec((1, D_pad)),             # tsgu norm gamma
            _const_spec((1, D_pad)),             # tsgu norm beta
            _const_spec((D_pad, A_pad)),         # proj_out weight (in, out)
            _const_spec((1, A_pad)),             # proj_out bias
            _const_spec((rows, D_pad)),          # shift mask (lo half)
            _const_spec((rows, D_pad)),          # shift mask (hi half)
        ],
        out_specs=pl.BlockSpec((rows, A_pad), lambda i: (i, 0)),
    )

    # ---- VMEM budget estimate (x/out double-buffered, constants single-buffered) ----
    xit = jnp.dtype(x.dtype).itemsize
    itm = jnp.dtype(matmul_dtype).itemsize
    est = (4 * rows * A_pad * xit                          # x + out tiles, double-buffered
           + (A_pad * E_pad + D_pad * A_pad) * itm         # weights (single buffer)
           + 2 * rows * D_pad * 4                          # shift masks
           + rows * (2 * A_pad + E_pad + 6 * D_pad) * 4    # live f32 intermediates headroom
           + (4 * A_pad + 2 * E_pad + 4 * D_pad) * 4)      # small param vectors
    vmem_limit = int(min(max(est * 5 // 4, 32 * 2**20), vmem_cap))

    rows_tot = B * T_pad
    cost = pl.CostEstimate(
        flops=int(2 * rows_tot * A_pad * E_pad + 2 * rows_tot * D_pad * A_pad),
        transcendentals=int(rows_tot * (E_pad + D_pad + 4)),
        bytes_accessed=int(2 * rows_tot * A_pad * xit
                           + (A_pad * E_pad + D_pad * A_pad) * itm
                           + 2 * rows * D_pad * 4
                           + (4 * A_pad + 2 * E_pad + 4 * D_pad) * 4),
    )

    out = pl.pallas_call(
        kernel,
        out_shape=jax.ShapeDtypeStruct((B * T_pad, A_pad), x.dtype),
        grid_spec=grid_spec,
        compiler_params=pltpu.CompilerParams(
            dimension_semantics=("parallel",),
            vmem_limit_bytes=vmem_limit,
        ),
        cost_estimate=cost,
    )(x_p, g_pre, b_pre, w_in_p, b_in_p, g_g, b_g, w_out_p, b_out_p, m_lo, m_hi)

    return out.reshape(B, T_pad, A_pad)[:, :T, :A]


# ---------- deterministic parameter init (synthetic weights) ----------
def init_params(key, adim, eunits):
    D = eunits // 2
    k = jax.random.split(key, 4)
    return dict(
        g_pre=jnp.ones((1, adim), jnp.float32),
        b_pre=jnp.zeros((1, adim), jnp.float32),
        w_in=jax.random.normal(k[0], (adim, eunits), jnp.float32) / np.sqrt(adim),
        b_in=0.01 * jax.random.normal(k[1], (1, eunits), jnp.float32),
        g_g=jnp.ones((1, D), jnp.float32),
        b_g=jnp.zeros((1, D), jnp.float32),
        w_out=jax.random.normal(k[2], (D, adim), jnp.float32) / np.sqrt(D),
        b_out=0.01 * jax.random.normal(k[3], (1, adim), jnp.float32),
    )


# ---------- pure-JAX reference (mirrors the PyTorch forward exactly) ----------
def tsmlp_ref(x, p, shift=1):
    def ln(v, g, b):
        mu = v.mean(-1, keepdims=True)
        var = ((v - mu) ** 2).mean(-1, keepdims=True)
        return (v - mu) / jnp.sqrt(var + LN_EPS) * g[0] + b[0]

    gelu = lambda v: 0.5 * v * (1.0 + jax.lax.erf(v * 0.7071067811865475))

    residual = x
    xn = ln(x, p["g_pre"], p["b_pre"])
    h = gelu(xn @ p["w_in"] + p["b_in"][0])
    D = h.shape[-1] // 2
    res, gate = h[..., :D], h[..., D:]
    gate = ln(gate, p["g_g"], p["b_g"])
    b_, t_, d_ = gate.shape
    d2 = d_ // 2
    pad = jnp.zeros((b_, shift, d2), gate.dtype)
    g1 = jnp.concatenate([pad, gate[:, :, :d2]], axis=1)[:, :-shift, :]
    g2 = jnp.concatenate([gate[:, :, d2:], pad], axis=1)[:, shift:, :]
    gate = jnp.concatenate([g1, g2], axis=2)
    out = gelu(gate) * res
    out = out @ p["w_out"] + p["b_out"][0]
    return residual + out


if __name__ == "__main__":
    key = jax.random.PRNGKey(0)
    kx, kp, kx2, kp2 = jax.random.split(key, 4)
    shift = 1

    # Small, non-lane-aligned shapes (exercises the A/D/T zero-padding path, grid=(2,)).
    B, T, adim, eunits = 2, 8, 32, 64
    x = jax.random.normal(kx, (B, T, adim), jnp.float32)
    params = init_params(kp, adim, eunits)
    y_ref = tsmlp_ref(x, params, shift=shift)

    y_f32 = jax.block_until_ready(
        tsmlp_block(x, params, shift_size=shift, matmul_dtype=jnp.float32))
    np.testing.assert_allclose(np.asarray(y_f32), np.asarray(y_ref), rtol=1e-4, atol=1e-4)

    y_bf16 = jax.block_until_ready(
        tsmlp_block(x, params, shift_size=shift, matmul_dtype=jnp.bfloat16))
    np.testing.assert_allclose(np.asarray(y_bf16), np.asarray(y_ref), rtol=5e-2, atol=5e-2)

    # Larger, lane-aligned shapes (no feature padding, multi-step grid, multi-sequence blocks).
    B2, T2, adim2, eunits2 = 4, 16, 128, 256
    x2 = jax.random.normal(kx2, (B2, T2, adim2), jnp.float32)
    params2 = init_params(kp2, adim2, eunits2)
    y2_ref = tsmlp_ref(x2, params2, shift=shift)

    y2_f32 = jax.block_until_ready(
        tsmlp_block(x2, params2, shift_size=shift, matmul_dtype=jnp.float32))
    np.testing.assert_allclose(np.asarray(y2_f32), np.asarray(y2_ref), rtol=1e-4, atol=1e-4)

    # Fast path: bf16 MXU operands + tanh-approximate (EUP) GELU, looser tolerance.
    y2_fast = jax.block_until_ready(
        tsmlp_block(x2, params2, shift_size=shift, matmul_dtype=jnp.bfloat16,
                    approx_gelu=True))
    np.testing.assert_allclose(np.asarray(y2_fast), np.asarray(y2_ref), rtol=1e-1, atol=1e-1)

    print("KERNEL_OK")
</pallas_src>

<mosaic_0001>
module attributes {stable_mosaic.version = 11 : i64} {
  func.func @tsmlp_kernel(%arg0: i32, %arg1: memref<8x128xf32, #tpu.memory_space<vmem>>, %arg2: memref<1x128xf32, #tpu.memory_space<vmem>>, %arg3: memref<1x128xf32, #tpu.memory_space<vmem>>, %arg4: memref<128x256xf32, #tpu.memory_space<vmem>>, %arg5: memref<1x256xf32, #tpu.memory_space<vmem>>, %arg6: memref<1x128xf32, #tpu.memory_space<vmem>>, %arg7: memref<1x128xf32, #tpu.memory_space<vmem>>, %arg8: memref<128x128xf32, #tpu.memory_space<vmem>>, %arg9: memref<1x128xf32, #tpu.memory_space<vmem>>, %arg10: memref<8x128xf32, #tpu.memory_space<vmem>>, %arg11: memref<8x128xf32, #tpu.memory_space<vmem>>, %arg12: memref<8x128xf32, #tpu.memory_space<vmem>>) attributes {dimension_semantics = [#tpu.dimension_semantics<parallel>], iteration_bounds = array<i64: 2>, scalar_prefetch = 0 : i64, scratch_operands = 0 : i64, tpu.core_type = #tpu.core_type<tc>, window_params = [{transform_indices = @transform_0, window_bounds = array<i64: 8, 128>}, {pipeline_mode = #tpu.pipeline_mode<synchronous>, transform_indices = @transform_1, window_bounds = array<i64: 1, 128>}, {pipeline_mode = #tpu.pipeline_mode<synchronous>, transform_indices = @transform_2, window_bounds = array<i64: 1, 128>}, {pipeline_mode = #tpu.pipeline_mode<synchronous>, transform_indices = @transform_3, window_bounds = array<i64: 128, 256>}, {pipeline_mode = #tpu.pipeline_mode<synchronous>, transform_indices = @transform_4, window_bounds = array<i64: 1, 256>}, {pipeline_mode = #tpu.pipeline_mode<synchronous>, transform_indices = @transform_5, window_bounds = array<i64: 1, 128>}, {pipeline_mode = #tpu.pipeline_mode<synchronous>, transform_indices = @transform_6, window_bounds = array<i64: 1, 128>}, {pipeline_mode = #tpu.pipeline_mode<synchronous>, transform_indices = @transform_7, window_bounds = array<i64: 128, 128>}, {pipeline_mode = #tpu.pipeline_mode<synchronous>, transform_indices = @transform_8, window_bounds = array<i64: 1, 128>}, {pipeline_mode = #tpu.pipeline_mode<synchronous>, transform_indices = @transform_9, window_bounds = array<i64: 8, 128>}, {pipeline_mode = #tpu.pipeline_mode<synchronous>, transform_indices = @transform_10, window_bounds = array<i64: 8, 128>}, {transform_indices = @transform_11, window_bounds = array<i64: 8, 128>}]} {
    %c0 = arith.constant 0 : index
    %c0_0 = arith.constant 0 : index
    %0 = vector.load %arg1[%c0, %c0_0] : memref<8x128xf32, #tpu.memory_space<vmem>>, vector<8x128xf32>
    %cst = arith.constant dense<0.000000e+00> : vector<8xf32>
    %1 = vector.multi_reduction <add>, %0, %cst [1] : vector<8x128xf32> to vector<8xf32>
    %2 = vector.shape_cast %1 : vector<8xf32> to vector<8x1xf32>
    %cst_1 = arith.constant 3.125000e-02 : f32
    %3 = vector.broadcast %cst_1 : f32 to vector<8x1xf32>
    %4 = arith.mulf %2, %3 : vector<8x1xf32>
    %5 = arith.mulf %0, %0 : vector<8x128xf32>
    %cst_2 = arith.constant dense<0.000000e+00> : vector<8xf32>
    %6 = vector.multi_reduction <add>, %5, %cst_2 [1] : vector<8x128xf32> to vector<8xf32>
    %7 = vector.shape_cast %6 : vector<8xf32> to vector<8x1xf32>
    %cst_3 = arith.constant 3.125000e-02 : f32
    %8 = vector.broadcast %cst_3 : f32 to vector<8x1xf32>
    %9 = arith.mulf %7, %8 : vector<8x1xf32>
    %10 = arith.mulf %4, %4 : vector<8x1xf32>
    %11 = arith.subf %9, %10 : vector<8x1xf32>
    %12 = vector.broadcast %4 : vector<8x1xf32> to vector<8x128xf32>
    %13 = arith.subf %0, %12 : vector<8x128xf32>
    %cst_4 = arith.constant 9.99999974E-6 : f32
    %14 = vector.broadcast %cst_4 : f32 to vector<8x1xf32>
    %15 = arith.addf %11, %14 : vector<8x1xf32>
    %16 = math.rsqrt %15 : vector<8x1xf32>
    %17 = vector.broadcast %16 : vector<8x1xf32> to vector<8x128xf32>
    %18 = arith.mulf %13, %17 : vector<8x128xf32>
    %c0_5 = arith.constant 0 : index
    %c0_6 = arith.constant 0 : index
    %19 = vector.load %arg2[%c0_5, %c0_6] : memref<1x128xf32, #tpu.memory_space<vmem>>, vector<1x128xf32>
    %20 = vector.broadcast %19 : vector<1x128xf32> to vector<8x128xf32>
    %21 = arith.mulf %18, %20 : vector<8x128xf32>
    %c0_7 = arith.constant 0 : index
    %c0_8 = arith.constant 0 : index
    %22 = vector.load %arg3[%c0_7, %c0_8] : memref<1x128xf32, #tpu.memory_space<vmem>>, vector<1x128xf32>
    %23 = vector.broadcast %22 : vector<1x128xf32> to vector<8x128xf32>
    %24 = arith.addf %21, %23 : vector<8x128xf32>
    %c0_9 = arith.constant 0 : index
    %c0_10 = arith.constant 0 : index
    %25 = vector.load %arg4[%c0_9, %c0_10] : memref<128x256xf32, #tpu.memory_space<vmem>>, vector<128x256xf32>
    %cst_11 = arith.constant dense<0.000000e+00> : vector<8x256xf32>
    %26 = tpu.matmul %24, %25, %cst_11 {dimension_numbers = #tpu.dot_dimension_numbers<[1], [0], [0], [1], [0, 0, 1, 1], [], []>} : vector<8x128xf32>, vector<128x256xf32>, vector<8x256xf32> -> vector<8x256xf32>
    %c0_12 = arith.constant 0 : index
    %c0_13 = arith.constant 0 : index
    %27 = vector.load %arg5[%c0_12, %c0_13] : memref<1x256xf32, #tpu.memory_space<vmem>>, vector<1x256xf32>
    %28 = vector.broadcast %27 : vector<1x256xf32> to vector<8x256xf32>
    %29 = arith.addf %26, %28 : vector<8x256xf32>
    %30 = vector.extract_strided_slice %29 {offsets = [0, 0], sizes = [8, 128], strides = [1, 1]} : vector<8x256xf32> to vector<8x128xf32>
    %cst_14 = arith.constant 5.000000e-01 : f32
    %31 = vector.broadcast %cst_14 : f32 to vector<8x128xf32>
    %32 = arith.mulf %31, %30 : vector<8x128xf32>
    %cst_15 = arith.constant 0.707106769 : f32
    %33 = vector.broadcast %cst_15 : f32 to vector<8x128xf32>
    %34 = arith.mulf %30, %33 : vector<8x128xf32>
    %35 = math.erf %34 : vector<8x128xf32>
    %cst_16 = arith.constant 1.000000e+00 : f32
    %36 = vector.broadcast %cst_16 : f32 to vector<8x128xf32>
    %37 = arith.addf %36, %35 : vector<8x128xf32>
    %38 = arith.mulf %32, %37 : vector<8x128xf32>
    %39 = vector.extract_strided_slice %29 {offsets = [0, 128], sizes = [8, 128], strides = [1, 1]} : vector<8x256xf32> to vector<8x128xf32>
    %cst_17 = arith.constant 5.000000e-01 : f32
    %40 = vector.broadcast %cst_17 : f32 to vector<8x128xf32>
    %41 = arith.mulf %40, %39 : vector<8x128xf32>
    %cst_18 = arith.constant 0.707106769 : f32
    %42 = vector.broadcast %cst_18 : f32 to vector<8x128xf32>
    %43 = arith.mulf %39, %42 : vector<8x128xf32>
    %44 = math.erf %43 : vector<8x128xf32>
    %cst_19 = arith.constant 1.000000e+00 : f32
    %45 = vector.broadcast %cst_19 : f32 to vector<8x128xf32>
    %46 = arith.addf %45, %44 : vector<8x128xf32>
    %47 = arith.mulf %41, %46 : vector<8x128xf32>
    %cst_20 = arith.constant dense<0.000000e+00> : vector<8xf32>
    %48 = vector.multi_reduction <add>, %47, %cst_20 [1] : vector<8x128xf32> to vector<8xf32>
    %49 = vector.shape_cast %48 : vector<8xf32> to vector<8x1xf32>
    %cst_21 = arith.constant 3.125000e-02 : f32
    %50 = vector.broadcast %cst_21 : f32 to vector<8x1xf32>
    %51 = arith.mulf %49, %50 : vector<8x1xf32>
    %52 = arith.mulf %47, %47 : vector<8x128xf32>
    %cst_22 = arith.constant dense<0.000000e+00> : vector<8xf32>
    %53 = vector.multi_reduction <add>, %52, %cst_22 [1] : vector<8x128xf32> to vector<8xf32>
    %54 = vector.shape_cast %53 : vector<8xf32> to vector<8x1xf32>
    %cst_23 = arith.constant 3.125000e-02 : f32
    %55 = vector.broadcast %cst_23 : f32 to vector<8x1xf32>
    %56 = arith.mulf %54, %55 : vector<8x1xf32>
    %57 = arith.mulf %51, %51 : vector<8x1xf32>
    %58 = arith.subf %56, %57 : vector<8x1xf32>
    %59 = vector.broadcast %51 : vector<8x1xf32> to vector<8x128xf32>
    %60 = arith.subf %47, %59 : vector<8x128xf32>
    %cst_24 = arith.constant 9.99999974E-6 : f32
    %61 = vector.broadcast %cst_24 : f32 to vector<8x1xf32>
    %62 = arith.addf %58, %61 : vector<8x1xf32>
    %63 = math.rsqrt %62 : vector<8x1xf32>
    %64 = vector.broadcast %63 : vector<8x1xf32> to vector<8x128xf32>
    %65 = arith.mulf %60, %64 : vector<8x128xf32>
    %c0_25 = arith.constant 0 : index
    %c0_26 = arith.constant 0 : index
    %66 = vector.load %arg6[%c0_25, %c0_26] : memref<1x128xf32, #tpu.memory_space<vmem>>, vector<1x128xf32>
    %67 = vector.broadcast %66 : vector<1x128xf32> to vector<8x128xf32>
    %68 = arith.mulf %65, %67 : vector<8x128xf32>
    %c0_27 = arith.constant 0 : index
    %c0_28 = arith.constant 0 : index
    %69 = vector.load %arg7[%c0_27, %c0_28] : memref<1x128xf32, #tpu.memory_space<vmem>>, vector<1x128xf32>
    %70 = vector.broadcast %69 : vector<1x128xf32> to vector<8x128xf32>
    %71 = arith.addf %68, %70 : vector<8x128xf32>
    %c1_i32 = arith.constant 1 : i32
    %72 = tpu.dynamic_rotate %71 by %c1_i32 dim 0 : vector<8x128xf32>, i32 -> vector<8x128xf32>
    %c7_i32 = arith.constant 7 : i32
    %73 = tpu.dynamic_rotate %71 by %c7_i32 dim 0 : vector<8x128xf32>, i32 -> vector<8x128xf32>
    %c0_29 = arith.constant 0 : index
    %c0_30 = arith.constant 0 : index
    %74 = vector.load %arg10[%c0_29, %c0_30] : memref<8x128xf32, #tpu.memory_space<vmem>>, vector<8x128xf32>
    %75 = arith.mulf %72, %74 : vector<8x128xf32>
    %c0_31 = arith.constant 0 : index
    %c0_32 = arith.constant 0 : index
    %76 = vector.load %arg11[%c0_31, %c0_32] : memref<8x128xf32, #tpu.memory_space<vmem>>, vector<8x128xf32>
    %77 = arith.mulf %73, %76 : vector<8x128xf32>
    %78 = arith.addf %75, %77 : vector<8x128xf32>
    %cst_33 = arith.constant 5.000000e-01 : f32
    %79 = vector.broadcast %cst_33 : f32 to vector<8x128xf32>
    %80 = arith.mulf %79, %78 : vector<8x128xf32>
    %cst_34 = arith.constant 0.707106769 : f32
    %81 = vector.broadcast %cst_34 : f32 to vector<8x128xf32>
    %82 = arith.mulf %78, %81 : vector<8x128xf32>
    %83 = math.erf %82 : vector<8x128xf32>
    %cst_35 = arith.constant 1.000000e+00 : f32
    %84 = vector.broadcast %cst_35 : f32 to vector<8x128xf32>
    %85 = arith.addf %84, %83 : vector<8x128xf32>
    %86 = arith.mulf %80, %85 : vector<8x128xf32>
    %87 = arith.mulf %86, %38 : vector<8x128xf32>
    %c0_36 = arith.constant 0 : index
    %c0_37 = arith.constant 0 : index
    %88 = vector.load %arg8[%c0_36, %c0_37] : memref<128x128xf32, #tpu.memory_space<vmem>>, vector<128x128xf32>
    %cst_38 = arith.constant dense<0.000000e+00> : vector<8x128xf32>
    %89 = tpu.matmul %87, %88, %cst_38 {dimension_numbers = #tpu.dot_dimension_numbers<[1], [0], [0], [1], [0, 0, 1, 1], [], []>} : vector<8x128xf32>, vector<128x128xf32>, vector<8x128xf32> -> vector<8x128xf32>
    %c0_39 = arith.constant 0 : index
    %c0_40 = arith.constant 0 : index
    %90 = vector.load %arg9[%c0_39, %c0_40] : memref<1x128xf32, #tpu.memory_space<vmem>>, vector<1x128xf32>
    %91 = vector.broadcast %90 : vector<1x128xf32> to vector<8x128xf32>
    %92 = arith.addf %89, %91 : vector<8x128xf32>
    %c0_41 = arith.constant 0 : index
    %c0_42 = arith.constant 0 : index
    %93 = vector.load %arg1[%c0_41, %c0_42] : memref<8x128xf32, #tpu.memory_space<vmem>>, vector<8x128xf32>
    %94 = arith.addf %93, %92 : vector<8x128xf32>
    %c0_43 = arith.constant 0 : index
    %c0_44 = arith.constant 0 : index
    %95 = vector.load %arg12[%c0_43, %c0_44] : memref<8x128xf32, #tpu.memory_space<vmem>>, vector<8x128xf32>
    tpu.vector_store %arg12[%c0_43, %c0_44], %94 {strides = array<i32>} : memref<8x128xf32, #tpu.memory_space<vmem>>, vector<8x128xf32>,
    return
  }
  func.func @transform_0(%arg0: i32) -> (i32, i32) {
    %c0_i32 = arith.constant 0 : i32
    %c0_i32_0 = arith.constant 0 : i32
    return %arg0, %c0_i32 : i32, i32
  }
  func.func @transform_1(%arg0: i32) -> (i32, i32) {
    %c0_i32 = arith.constant 0 : i32
    %c0_i32_0 = arith.constant 0 : i32
    %c0_i32_1 = arith.constant 0 : i32
    return %c0_i32, %c0_i32_0 : i32, i32
  }
  func.func @transform_2(%arg0: i32) -> (i32, i32) {
    %c0_i32 = arith.constant 0 : i32
    %c0_i32_0 = arith.constant 0 : i32
    %c0_i32_1 = arith.constant 0 : i32
    return %c0_i32, %c0_i32_0 : i32, i32
  }
  func.func @transform_3(%arg0: i32) -> (i32, i32) {
    %c0_i32 = arith.constant 0 : i32
    %c0_i32_0 = arith.constant 0 : i32
    %c0_i32_1 = arith.constant 0 : i32
    return %c0_i32, %c0_i32_0 : i32, i32
  }
  func.func @transform_4(%arg0: i32) -> (i32, i32) {
    %c0_i32 = arith.constant 0 : i32
    %c0_i32_0 = arith.constant 0 : i32
    %c0_i32_1 = arith.constant 0 : i32
    return %c0_i32, %c0_i32_0 : i32, i32
  }
  func.func @transform_5(%arg0: i32) -> (i32, i32) {
    %c0_i32 = arith.constant 0 : i32
    %c0_i32_0 = arith.constant 0 : i32
    %c0_i32_1 = arith.constant 0 : i32
    return %c0_i32, %c0_i32_0 : i32, i32
  }
  func.func @transform_6(%arg0: i32) -> (i32, i32) {
    %c0_i32 = arith.constant 0 : i32
    %c0_i32_0 = arith.constant 0 : i32
    %c0_i32_1 = arith.constant 0 : i32
    return %c0_i32, %c0_i32_0 : i32, i32
  }
  func.func @transform_7(%arg0: i32) -> (i32, i32) {
    %c0_i32 = arith.constant 0 : i32
    %c0_i32_0 = arith.constant 0 : i32
    %c0_i32_1 = arith.constant 0 : i32
    return %c0_i32, %c0_i32_0 : i32, i32
  }
  func.func @transform_8(%arg0: i32) -> (i32, i32) {
    %c0_i32 = arith.constant 0 : i32
    %c0_i32_0 = arith.constant 0 : i32
    %c0_i32_1 = arith.constant 0 : i32
    return %c0_i32, %c0_i32_0 : i32, i32
  }
  func.func @transform_9(%arg0: i32) -> (i32, i32) {
    %c0_i32 = arith.constant 0 : i32
    %c0_i32_0 = arith.constant 0 : i32
    %c0_i32_1 = arith.constant 0 : i32
    return %c0_i32, %c0_i32_0 : i32, i32
  }
  func.func @transform_10(%arg0: i32) -> (i32, i32) {
    %c0_i32 = arith.constant 0 : i32
    %c0_i32_0 = arith.constant 0 : i32
    %c0_i32_1 = arith.constant 0 : i32
    return %c0_i32, %c0_i32_0 : i32, i32
  }
  func.func @transform_11(%arg0: i32) -> (i32, i32) {
    %c0_i32 = arith.constant 0 : i32
    %c0_i32_0 = arith.constant 0 : i32
    return %arg0, %c0_i32 : i32, i32
  }
}

</mosaic_0001>

<bundles_post_ra>
// kernel: tpu_custom_call.1
= control target key start
LH: loop header
LB: loop body
LE: loop exit
PB: predicated region body
PF: predicated region fallthrough
CT: control target
= control target key end

     0   :  { %s1803_s0 = inlined_call_operand.hbm [shape: f32[16,128], index: 0, kind: input, shape index: {}]   ;;  %s1804_s1 = inlined_call_operand.hbm [shape: f32[1,128], index: 1, kind: input, shape index: {}]   ;;  %s1805_s2 = inlined_call_operand.hbm [shape: f32[1,128], index: 2, kind: input, shape index: {}]   ;;  %s1806_s3 = inlined_call_operand.hbm [shape: f32[128,256], index: 3, kind: input, shape index: {}]   ;;  %s1807_s4 = inlined_call_operand.vmem [shape: f32[1,256], index: 4, kind: input, shape index: {}]   ;;  %s1808_s5 = inlined_call_operand.hbm [shape: f32[1,128], index: 5, kind: input, shape index: {}]   ;;  %s1809_s6 = inlined_call_operand.vmem [shape: f32[1,128], index: 6, kind: input, shape index: {}]   ;;  %s1810_s7 = inlined_call_operand.hbm [shape: f32[128,128], index: 7, kind: input, shape index: {}]   ;;  %s1811_s8 = inlined_call_operand.vmem [shape: f32[1,128], index: 8, kind: input, shape index: {}]   ;;  %s1812_s9 = inlined_call_operand.vmem [shape: f32[8,128], index: 9, kind: input, shape index: {}]   ;;  %s1813_s10 = inlined_call_operand.vmem [shape: f32[8,128], index: 10, kind: input, shape index: {}]   ;;  %s1814_s11 = inlined_call_operand.hbm [shape: f32[16,128], index: 11, kind: output, shape index: {}]  }
   0x1   :  { %1819 = sst [smem:[#allocation19_spill]] %s1804_s1 }
   0x2   :  { %1820 = sst [smem:[#allocation20_spill]] %s1805_s2 }
   0x3   :  { %1821 = sst [smem:[#allocation21_spill]] %s1814_s11 }
   0x4   :  { %16 = vsyncpa [#allocation3], 0 }
   0x5   :  { %18 = vsyncpa [#allocation3 + $0x1], 0 }
   0x6   :  { %19 = vsyncpa [#allocation6], 0 }
   0x7   :  { %20 = vsyncpa [#allocation9], 0 }
   0x8   :  { %21 = vsyncpa [#allocation12], 0 }
   0x9   :  { %22 = vsyncpa [#allocation4], 0 }
   0xa   :  { %24 = vsyncpa [#allocation4 + $0x1], 0  ;;  %s1466_s17 = smov 0   ;;  %s1468_s18 = smov 0  }
   0xb   :  { %s1470_s19 = smov 0   ;;  %s1472_s20 = smov 0  }
   0xc LB: > { %s1392_s21 = smov [#allocation5]   ;;  %s1487_s23 = sadd.s32 4294967295, %s1390_s20   ;;  %s1390_s20 = sphi %s1472_s20, %s1846_s20   ;;  %s1386_s19 = sphi %s1470_s19, %s1845_s19   ;;  %s1382_s18 = sphi %s1468_s18, %s1844_s18   ;;  %s1378_s17 = sphi %s1466_s17, %s1843_s17  }
   0xd   : > { %s310_s22 = sshll.u32 %s1392_s21, 4  ;;  %p894_p0 = scmp.ge.s32.totalorder %s1390_s20, 1  ;;  %s1492_s22 = int_to_ptr.vmem [resolvable:$true] %s310_s22 }
   0xe   : > { %p1816_p1 = scmp.eq.s32.totalorder %s1487_s23, 0  ;;  %p297_p2 = scmp.lt.s32.totalorder %s1390_s20, 3 }
   0xf   : > { %s1393_s25 = smov [#allocation8]   ;;  %s1394_s28 = smov [#allocation7]  }
  0x10   : > { %p1494_p3 = pnand %p894_p0, %p297_p2  ;;  %s331_s26 = sshll.u32 %s1393_s25, 4  ;;  %s1501_s26 = int_to_ptr.vmem [resolvable:$true] %s331_s26 }
  0x11   : > { %s321_s29 = sshll.u32 %s1394_s28, 4  ;;  %s1824_s1 = sld [smem:[#allocation19_spill]]  ;;  %s1509_s29 = int_to_ptr.vmem [resolvable:$true] %s321_s29 }
  0x12   : > { %s1822_s24 = scalar_select %p1494_p3, 1, 0 }
  0x13   : > { %p1052_p5 = pneg %p1494_p3 }
  0x15   : > { %p1505_p6 = pnand %p1052_p5, %p1816_p1 }
  0x17   : > { %s1142_s13 = scalar_lea.hbm %s1824_s1, 16  ;;  %p1519_p8 = pneg %p1505_p6 }
  0x18   : > { %p1143_p7 = scmp.ne.s32.totalorder %s1824_s1, %s1142_s13  ;;  %p1149_p11 = scmp.lt.u32.totalorder %s1142_s13, %s1824_s1 }
  0x1a   : > { %p1145_p9 = pnand %p1519_p8, %p1143_p7 }
  0x1c   : > { %p1146_p10 = pneg %p1145_p9 }
  0x1e   : > { %p1151_p12 = pnand %p1149_p11, %p1146_p10 }
  0x20   : > { %1154 = shalt.err (!%p1151_p12)
}
  0x21   : > { %s1155_s28 = scalar_lea.vmem %s1492_s22, 16  ;;  %s1162_s30 = scalar_lea.vmem %s1492_s22, 32 }
  0x22   : > { %p1156_p13 = scmp.ne.s32.totalorder %s1492_s22, %s1155_s28  ;;  %p1163_p5 = scmp.lt.s32.totalorder %s1492_s22, %s1492_s22 }
  0x23   : > { %p1164_p7 = scmp.lt.s32.totalorder %s1162_s30, %s1155_s28 }
  0x24   : > { %p1158_p0 = pnand %p1156_p13, %p1519_p8 }
  0x25   : > { %p1165_p9 = por %p1164_p7, %p1163_p5 }
  0x26   : > { %p1159_p2 = pneg %p1158_p0 }
  0x28   : > { %p1166_p4 = pnand %p1165_p9, %p1159_p2 }
  0x2a   : > { %1169 = shalt.err (!%p1166_p4)
}
  0x2b   : > { %1055 = dma.hbm_to_vmem [thread:$0]  (!%p1505_p6), %s1824_s1, 16, %s1492_s22, [#allocation6]  }
  0x2c   : > { %s1170_s21 = scalar_lea.hbm %s1806_s3, 4096 }
  0x2d   : > { %p1171_p10 = scmp.ne.s32.totalorder %s1806_s3, %s1170_s21  ;;  %p1177_p4 = scmp.lt.u32.totalorder %s1170_s21, %s1806_s3 }
  0x2f   : > { %p1173_p11 = pnand %p1171_p10, %p1519_p8 }
  0x31   : > { %p1174_p12 = pneg %p1173_p11 }
  0x33   : > { %p1179_p13 = pnand %p1177_p4, %p1174_p12 }
  0x35   : > { %1182 = shalt.err (!%p1179_p13)
}
  0x36   : > { %s1183_s22 = scalar_lea.vmem %s1501_s26, 4096  ;;  %p1191_p7 = scmp.lt.s32.totalorder %s1501_s26, %s1501_s26 }
  0x37   : > { %p1184_p0 = scmp.ne.s32.totalorder %s1501_s26, %s1183_s22  ;;  %p1192_p9 = scmp.lt.s32.totalorder %s1183_s22, %s1183_s22 }
  0x39   : > { %p1186_p2 = pnand %p1184_p0, %p1519_p8  ;;  %p1193_p10 = por %p1192_p9, %p1191_p7 }
  0x3b   : > { %p1187_p5 = pneg %p1186_p2 }
  0x3d   : > { %p1194_p11 = pnand %p1193_p10, %p1187_p5 }
  0x3f   : > { %1197 = shalt.err (!%p1194_p11)
}
  0x40   : > { %s1395_s11 = smov 256   ;;  %s1396_s12 = smov 16  }
  0x41   : > { %1061 = dma.hbm_to_vmem [thread:$0]  (!%p1505_p6), %s1806_s3, 4096, %s1501_s26, [#allocation9], %s1395_s11, %s1395_s11, %s1396_s12  }
  0x42   : > { %s1826_s2 = sld [smem:[#allocation20_spill]] }
  0x48   : > { %s1198_s25 = scalar_lea.hbm %s1826_s2, 16 }
  0x49   : > { %p1199_p12 = scmp.ne.s32.totalorder %s1826_s2, %s1198_s25  ;;  %p1205_p0 = scmp.lt.u32.totalorder %s1198_s25, %s1826_s2 }
  0x4b   : > { %p1201_p4 = pnand %p1199_p12, %p1519_p8 }
  0x4d   : > { %p1202_p13 = pneg %p1201_p4 }
  0x4f   : > { %p1207_p2 = pnand %p1205_p0, %p1202_p13 }
  0x51   : > { %1210 = shalt.err (!%p1207_p2)
}
  0x52   : > { %s1211_s26 = scalar_lea.vmem %s1509_s29, 16  ;;  %s1218_s11 = scalar_lea.vmem %s1509_s29, 32 }
  0x53   : > { %p1212_p5 = scmp.ne.s32.totalorder %s1509_s29, %s1211_s26  ;;  %p1219_p10 = scmp.lt.s32.totalorder %s1509_s29, %s1509_s29 }
  0x54   : > { %p1220_p11 = scmp.lt.s32.totalorder %s1218_s11, %s1211_s26 }
  0x55   : > { %p1214_p7 = pnand %p1212_p5, %p1519_p8 }
  0x56   : > { %p1221_p12 = por %p1220_p11, %p1219_p10 }
  0x57   : > { %p1215_p9 = pneg %p1214_p7 }
  0x59   : > { %p1222_p4 = pnand %p1221_p12, %p1215_p9 }
  0x5b   : > { %1225 = shalt.err (!%p1222_p4)
}
  0x5c   : > { %1058 = dma.hbm_to_vmem [thread:$0]  (!%p1505_p6), %s1826_s2, 16, %s1509_s29, [#allocation6]  }
  0x5d   : > { %s1397_s13 = smov [#allocation10]   ;;  %s1398_s15 = smov [#allocation11]  }
  0x5e   : > { %s348_s14 = sshll.u32 %s1397_s13, 4  ;;  %s361_s21 = sshll.u32 %s1398_s15, 4  ;;  %s349_s14 = int_to_ptr.vmem [resolvable:$true] %s348_s14  ;;  %s362_s21 = int_to_ptr.vmem [resolvable:$true] %s361_s21 }
  0x5f   : > { %s1226_s30 = scalar_lea.hbm %s1808_s5, 16 }
  0x60   : > { %p1227_p13 = scmp.ne.s32.totalorder %s1808_s5, %s1226_s30  ;;  %p1233_p5 = scmp.lt.u32.totalorder %s1226_s30, %s1808_s5 }
  0x62   : > { %p1229_p0 = pnand %p1227_p13, %p1519_p8 }
  0x64   : > { %p1230_p2 = pneg %p1229_p0 }
  0x66   : > { %p1235_p7 = pnand %p1233_p5, %p1230_p2 }
  0x68   : > { %1238 = shalt.err (!%p1235_p7)
}
  0x69   : > { %s1239_s29 = scalar_lea.vmem %s349_s14, 16  ;;  %s1246_s12 = scalar_lea.vmem %s349_s14, 32 }
  0x6a   : > { %p1240_p9 = scmp.ne.s32.totalorder %s349_s14, %s1239_s29  ;;  %p1247_p12 = scmp.lt.s32.totalorder %s349_s14, %s349_s14 }
  0x6b   : > { %p1248_p4 = scmp.lt.s32.totalorder %s1246_s12, %s1239_s29 }
  0x6c   : > { %p1242_p10 = pnand %p1240_p9, %p1519_p8 }
  0x6d   : > { %p1249_p1 = por %p1248_p4, %p1247_p12 }
  0x6e   : > { %p1243_p11 = pneg %p1242_p10 }
  0x70   : > { %p1250_p3 = pnand %p1249_p1, %p1243_p11 }
  0x72   : > { %1253 = shalt.err (!%p1250_p3)
}
  0x73   : > { %1064 = dma.hbm_to_vmem [thread:$0]  (!%p1505_p6), %s1808_s5, 16, %s349_s14, [#allocation9]  }
  0x74   : > { %s1254_s30 = scalar_lea.hbm %s1810_s7, 2048 }
  0x75   : > { %p1255_p13 = scmp.ne.s32.totalorder %s1810_s7, %s1254_s30  ;;  %p1261_p3 = scmp.lt.u32.totalorder %s1254_s30, %s1810_s7 }
  0x77   : > { %p1257_p0 = pnand %p1255_p13, %p1519_p8 }
  0x79   : > { %p1258_p1 = pneg %p1257_p0 }
  0x7b   : > { %p1263_p2 = pnand %p1261_p3, %p1258_p1 }
  0x7d   : > { %1266 = shalt.err (!%p1263_p2)
}
  0x7e   : > { %s1267_s29 = scalar_lea.vmem %s362_s21, 2048  ;;  %p1275_p10 = scmp.lt.s32.totalorder %s362_s21, %s362_s21 }
  0x7f   : > { %p1268_p5 = scmp.ne.s32.totalorder %s362_s21, %s1267_s29  ;;  %p1276_p11 = scmp.lt.s32.totalorder %s1267_s29, %s1267_s29 }
  0x81   : > { %p1270_p7 = pnand %p1268_p5, %p1519_p8  ;;  %p1277_p12 = por %p1276_p11, %p1275_p10 }
  0x83   : > { %p1271_p9 = pneg %p1270_p7 }
  0x85   : > { %p1278_p4 = pnand %p1277_p12, %p1271_p9 }
  0x87   : > { %1281 = shalt.err (!%p1278_p4)
}
  0x88   : > { %s1399_s14 = smov 128   ;;  %s1400_s16 = smov 8  }
  0x89   : > { %1067 = dma.hbm_to_vmem [thread:$0]  (!%p1505_p6), %s1810_s7, 2048, %s362_s21, [#allocation12], %s1399_s14, %s1399_s14, %s1400_s16  }
  0x8a   : > { %s893_s15 = sadd.s32 4294967294, %s1390_s20   ;;  %s1626_s25 = sadd.s32 1, %s1390_s20  }
  0x8b   : > { %s37_s28 = sadd.s32 1, %s1386_s19  ;;  %s34_s30 = ssub.s32 %s1390_s20, %s1626_s25 }
  0x8c   : > { %p44_p8 = scmp.ne.s32.totalorder %s1386_s19, %s1382_s18  ;;  %p35_p13 = scmp.eq.s32.totalorder %s34_s30, 0 }
  0x8d   : > { %p45_p0 = scmp.eq.s32.totalorder %s1390_s20, 0  ;;  %p50_p1 = scmp.ne.s32.totalorder %s1382_s18, %s1378_s17 }
  0x8e   : > { %p284_p3 = scmp.eq.s32.totalorder %s1487_s23, 1  ;;  %p1827_p5 = scmp.eq.s32.totalorder %s1487_s23, 0 }
  0x8f   : > { %s1638_s22 = scalar_select %p35_p13, %s1386_s19, %s37_s28  }
  0x90   : > { %p46_p2 = por %p45_p0, %p44_p8  ;;  %p1642_p7 = por %p1827_p5, %p50_p1 }
  0x91   : > { %p1646_p6 = por %p284_p3, %p44_p8  ;;  %p290_p9 = scmp.eq.s32.totalorder %s893_s15, 1 }
  0x92   : > { %p1081_p10 = scmp.lt.s32.totalorder %s1390_s20, 2  ;;  %s384_s26 = sand.u32 1, %s1386_s19  }
  0x93   : > { %s1829_s21 = scalar_select %p1646_p6, 1, 0 }
  0x94   : > { %p1652_p11 = por %p290_p9, %p50_p1  ;;  %s901_s1 = sshll.u32 %s384_s26, 3 }
  0x95   : > { %s902_s29 = sshll.u32 %s1390_s20, 7  ;;  %s388_s13 = scalar_lea.vmem [#allocation2], %s901_s1 }
  0x96   : > { %s1830_s11 = scalar_select %p1652_p11, 1, 0 }
  0x97   : > { %s1660_s12 = scalar_lea.hbm %s1803_s0, %s902_s29  ;;  %s395_s28 = sshll.u32 %s388_s13, 4  ;;  %s1666_s28 = int_to_ptr.vmem [resolvable:$true] %s395_s28 }
  0x98   : > { %p1662_p12 = pnand %p1081_p10, %p46_p2  ;;  %s385_s30 = scalar_lea.sflag [#allocation3], %s384_s26 }
  0x99   : > { %s1282_s2 = scalar_lea.hbm %s1660_s12, 128  ;;  %s1287_s14 = scalar_lea.hbm %s1803_s0, 256 }
  0x9a   : > { %p1283_p4 = scmp.ne.s32.totalorder %s1660_s12, %s1282_s2  ;;  %p1284_p8 = pneg %p1662_p12 }
  0x9b   : > { %p1288_p1 = scmp.lt.u32.totalorder %s1660_s12, %s1803_s0  ;;  %p1289_p3 = scmp.lt.u32.totalorder %s1287_s14, %s1282_s2 }
  0x9c   : > { %p1285_p13 = pnand %p1284_p8, %p1283_p4  ;;  %p1291_p5 = scmp.lt.u32.totalorder %s1282_s2, %s1660_s12 }
  0x9d   : > { %p1290_p2 = por %p1289_p3, %p1288_p1 }
  0x9e   : > { %p1286_p0 = pneg %p1285_p13 }
  0x9f   : > { %p1292_p9 = por %p1291_p5, %p1290_p2 }
  0xa1   : > { %p1293_p10 = pnand %p1292_p9, %p1286_p0 }
  0xa3   : > { %1296 = shalt.err (!%p1293_p10)
}
  0xa4   : > { %s1297_s26 = scalar_lea.vmem %s1666_s28, 128  ;;  %s1401_s29 = smov [#allocation2]  }
  0xa5   : > { %p1298_p4 = scmp.ne.s32.totalorder %s1666_s28, %s1297_s26  ;;  %s1302_s1 = sshll.u32 %s1401_s29, 4  ;;  %s1303_s1 = int_to_ptr.vmem [resolvable:$false] %s1302_s1 }
  0xa6   : > { %s1304_s16 = scalar_lea.vmem %s1303_s1, 256  ;;  %p1305_p6 = scmp.lt.s32.totalorder %s1666_s28, %s1303_s1 }
  0xa7   : > { %p1300_p13 = pnand %p1298_p4, %p1284_p8  ;;  %p1306_p1 = scmp.lt.s32.totalorder %s1304_s16, %s1297_s26 }
  0xa9   : > { %p1301_p11 = pneg %p1300_p13  ;;  %p1307_p3 = por %p1306_p1, %p1305_p6 }
  0xab   : > { %p1308_p2 = pnand %p1307_p3, %p1301_p11 }
  0xad   : > { %1311 = shalt.err (!%p1308_p2)
}
  0xae   : > { %1071 = dma.hbm_to_vmem [thread:$0]  (!%p1662_p12), %s1660_s12, 128, %s1666_s28, %s385_s30  }
  0xaf   : > { %p1832_p0 = scmp.ne.s32.totalorder %s1822_s24, 0 }
  0xb0   : > { %s1696_s2 = sand.u32 (!%p1832_p0), 1, %s1382_s18  }
  0xb1   : > { %404 = sbr.rel (%p1832_p0) target bundleno = 1020 (0x3fc), region = 64  ;;  %s904_s14 = sshll.u32 (!%p1832_p0), %s1696_s2, 3 }
  0xb2   : > { %s407_s13 = scalar_lea.sflag (!%p1832_p0), [#allocation3], %s1696_s2  ;;  %s410_s26 = scalar_lea.vmem (!%p1832_p0), [#allocation2], %s904_s14 }
  0xb8   : > { %1357 = dma.done.wait (%p1642_p7), %s407_s13, 128  }
  0xb9   : > { %1359 = vsyncadd (%p1642_p7), %s407_s13, 4294967168  ;;  %p1833_p6 = scmp.eq.s32.totalorder %s1487_s23, 0 }
  0xbb   : > { %1361 = dma.done.wait (%p1833_p6), [#allocation6], 32   ;;  %p1834_p11 = pmov %p1833_p6 }
  0xbc   : > { %p1835_p12 = pmov %p1833_p6 }
  0xbd   : > { %1363 = vsyncadd (%p1834_p11), [#allocation6], 4294967264 }
  0xbe   : > { %1365 = dma.done.wait (%p1835_p12), [#allocation9], 4112   ;;  %p1836_p8 = pmov %p1833_p6 }
  0xbf   : > { %p1837_p5 = pmov %p1833_p6 }
  0xc0   : > { %1367 = vsyncadd (%p1836_p8), [#allocation9], 4294963184 }
  0xc1   : > { %1369 = dma.done.wait (%p1837_p5), [#allocation12], 2048   ;;  %p1838_p9 = pmov %p1837_p5 }
  0xc2   : > { %v1718_v0 = vld [vmem:[%s410_s26] sm:$0xff]  ;;  %v499_v5 = vld [vmem:[#allocation8] sm:$0xff]  ;;  %v1402_v39 = vmov 0.0   ;;  %v911_v60 = vld [vmem:[#allocation5] ss:$0 sm:$0xff]  ;;  %vm1404_vm0 = vmmov 0  }
  0xc3   : > { %1371 = vsyncadd (%p1838_p9), [#allocation12], 4294965248  ;;  %v500_v1 = vld [vmem:[#allocation8 + $0x8] sm:$0xff]  ;;  %v502_v2 = vld [vmem:[#allocation8 + $0x18] sm:$0xff]  ;;  %470 = vadd.xlane.f32.xlu0 %v1718_v0  ;;  %v473_v3 = vmul.f32 %v1718_v0, %v1718_v0  ;;  %607 = vmatprep.mubr.f32.mxu0 %v1402_v39  ;;  %s917_s26 = sshll.u32 %s1487_s23, 7  ;;  %s468_s24 = scalar_lea.vmem [#allocation13], %s904_s14 }
  0xc4   : > { %v972_v4 = vpack.c.bf16 %v502_v2, %v500_v1  ;;  %v501_v6 = vld [vmem:[#allocation8 + $0x10] sm:$0xff]  ;;  %v504_v7 = vld [vmem:[#allocation8 + $0x28] sm:$0xff]  ;;  %v506_v9 = vld [vmem:[#allocation8 + $0x38] sm:$0xff]  ;;  %v533_v2 = vlaneseq  ;;  %969 = vmatprep.mubr.msk.f32.mxu1 %vm1404_vm0, %v1402_v39  ;;  %s775_s27 = sshll.u32 %s468_s24, 4  ;;  %s1839_s15 = sld [smem:[#allocation21_spill]]  ;;  %s1761_s27 = int_to_ptr.vmem [resolvable:$true] %s775_s27 }
  0xc5   : > { %v974_v8 = vpack.c.bf16 %v501_v6, %v499_v5  ;;  %v976_v10 = vpack.c.bf16 %v506_v9, %v504_v7  ;;  %v503_v11 = vld [vmem:[#allocation8 + $0x20] sm:$0xff]  ;;  %v505_v12 = vld [vmem:[#allocation8 + $0x30] sm:$0xff]  ;;  %v508_v14 = vld [vmem:[#allocation8 + $0x48] sm:$0xff]  ;;  %s762_s29 = scalar_lea.sflag [#allocation4], %s1696_s2  ;;  %s1312_s23 = scalar_lea.vmem %s1761_s27, 128 }
  0xc6   : > { %973 = vmatprep.subr.bf16.mxu0 %v972_v4  ;;  %v978_v13 = vpack.c.bf16 %v505_v12, %v503_v11  ;;  %v510_v15 = vld [vmem:[#allocation8 + $0x58] sm:$0xff]  ;;  %v507_v17 = vld [vmem:[#allocation8 + $0x40] sm:$0xff]  ;;  %v509_v18 = vld [vmem:[#allocation8 + $0x50] sm:$0xff]  ;;  %p1313_p7 = scmp.ne.s32.totalorder %s1761_s27, %s1312_s23  ;;  %p1840_p10 = scmp.ne.s32.totalorder %s1829_s21, 0 }
  0xc7   : > { %975 = vmatpush1.bf16.msra.mxu0 %v974_v8  ;;  %474 = vadd.xlane.f32.xlu0 %v473_v3  ;;  %v980_v16 = vpack.c.bf16 %v510_v15, %v508_v14  ;;  %v982_v19 = vpack.c.bf16 %v509_v18, %v507_v17  ;;  %v512_v20 = vld [vmem:[#allocation8 + $0x68] sm:$0xff]  ;;  %v514_v21 = vld [vmem:[#allocation8 + $0x78] sm:$0xff]  ;;  %v511_v23 = vld [vmem:[#allocation8 + $0x60] sm:$0xff]  ;;  %v1725_v3 = vshrl.u32 %v533_v2, 7  ;;  %s1405_s14 = smov [#allocation13]  }
  0xc8   : > { %977 = vmatprep.subr.bf16.mxu0 %v976_v10  ;;  %v984_v22 = vpack.c.bf16 %v514_v21, %v512_v20  ;;  %v513_v24 = vld [vmem:[#allocation8 + $0x70] sm:$0xff]  ;;  %v516_v26 = vld [vmem:[#allocation8 + $0x88] sm:$0xff]  ;;  %v518_v27 = vld [vmem:[#allocation8 + $0x98] sm:$0xff]  ;;  %p1314_p4 = pnand %p1313_p7, %p1840_p10  ;;  %s1316_s1 = sshll.u32 %s1405_s14, 4  ;;  %s1317_s1 = int_to_ptr.vmem [resolvable:$false] %s1316_s1 }
  0xc9   : > { %v986_v25 = vpack.c.bf16 %v513_v24, %v511_v23  ;;  %v988_v28 = vpack.c.bf16 %v518_v27, %v516_v26  ;;  %v515_v29 = vld [vmem:[#allocation8 + $0x80] sm:$0xff]  ;;  %v517_v30 = vld [vmem:[#allocation8 + $0x90] sm:$0xff]  ;;  %v520_v32 = vld [vmem:[#allocation8 + $0xa8] sm:$0xff]  ;;  %v539_v4 = vsub.s32 1, %v1725_v3  ;;  %s1318_s16 = scalar_lea.vmem %s1317_s1, 256  ;;  %p1319_p1 = scmp.lt.s32.totalorder %s1761_s27, %s1317_s1 }
  0xca   : > { %v990_v31 = vpack.c.bf16 %v517_v30, %v515_v29  ;;  %v522_v33 = vld [vmem:[#allocation8 + $0xb8] sm:$0xff]  ;;  %v519_v34 = vld [vmem:[#allocation8 + $0xa0] sm:$0xff]  ;;  %v521_v36 = vld [vmem:[#allocation8 + $0xb0] sm:$0xff]  ;;  %s1759_s30 = scalar_lea.hbm %s1839_s15, %s917_s26  ;;  %p1315_p13 = pneg %p1314_p4 }
  0xcb   : > { %979 = vmatpush1.bf16.msra.mxu0 %v978_v13  ;;  %v992_v35 = vpack.c.bf16 %v522_v33, %v520_v32  ;;  %v524_v37 = vld [vmem:[#allocation8 + $0xc8] sm:$0xff]  ;;  %v526_v38 = vld [vmem:[#allocation8 + $0xd8] sm:$0xff]  ;;  %v994_v40 = vpack.c.bf16 %v521_v36, %v519_v34  ;;  %v523_v42 = vld [vmem:[#allocation8 + $0xc0] sm:$0xff]  ;;  %p1320_p3 = scmp.lt.s32.totalorder %s1318_s16, %s1312_s23 }
  0xcc   : > { %981 = vmatprep.subr.bf16.mxu0 %v980_v16  ;;  %v996_v41 = vpack.c.bf16 %v526_v38, %v524_v37  ;;  %v525_v43 = vld [vmem:[#allocation8 + $0xd0] sm:$0xff]  ;;  %v528_v44 = vld [vmem:[#allocation8 + $0xe8] sm:$0xff]  ;;  %v530_v45 = vld [vmem:[#allocation8 + $0xf8] sm:$0xff] }
  0xcd   : > { %v998_v46 = vpack.c.bf16 %v525_v43, %v523_v42  ;;  %v1000_v47 = vpack.c.bf16 %v530_v45, %v528_v44  ;;  %v527_v48 = vld [vmem:[#allocation8 + $0xe0] sm:$0xff]  ;;  %v529_v49 = vld [vmem:[#allocation8 + $0xf0] sm:$0xff]  ;;  %v912_v62 = vld [vmem:[#allocation7] ss:$0 sm:$0xff]  ;;  %p1321_p2 = por %p1320_p3, %p1319_p1 }
  0xce   : > { %v1002_v50 = vpack.c.bf16 %v529_v49, %v527_v48  ;;  %v1731_v5 = vld [vmem:[%s1807_s4] sm:$0x3]  ;;  %v666_v16 = vld [vmem:[#allocation11] sm:$0xff]  ;;  %v668_v20 = vld [vmem:[#allocation11 + $0x10] sm:$0xff]  ;;  %v535_v48 = vsub.s32 0, %v1725_v3 }
  0xcf   : > { %983 = vmatpush1.bf16.msra.mxu0 %v982_v19  ;;  %v540_v6 = vrot.slane %v1731_v5, %v539_v4  ;;  %v667_v17 = vld [vmem:[#allocation11 + $0x8] sm:$0xff]  ;;  %v1403_v19 = vmov 0.0|0.0   ;;  %v669_v21 = vld [vmem:[#allocation11 + $0x18] sm:$0xff]  ;;  %v670_v23 = vld [vmem:[#allocation11 + $0x20] sm:$0xff]  ;;  %p1322_p0 = pnand %p1321_p2, %p1315_p13 }
  0xd0   : > { %985 = vmatprep.subr.bf16.mxu0 %v984_v22  ;;  %v1005_v18 = vpack.c.bf16 %v667_v17, %v666_v16  ;;  %1004 = vmatprep.subr.bf16.mxu1 %v1403_v19  ;;  %v1008_v22 = vpack.c.bf16 %v669_v21, %v668_v20  ;;  %v671_v24 = vld [vmem:[#allocation11 + $0x28] sm:$0xff]  ;;  %v672_v26 = vld [vmem:[#allocation11 + $0x30] sm:$0xff]  ;;  %v673_v27 = vld [vmem:[#allocation11 + $0x38] sm:$0xff]  ;;  %v536_v49 = vrot.slane %v1731_v5, %v535_v48 }
  0xd1   : > { %v674_v29 = vld [vmem:[#allocation11 + $0x40] sm:$0xff]  ;;  %v675_v30 = vld [vmem:[#allocation11 + $0x48] sm:$0xff]  ;;  %v676_v32 = vld [vmem:[#allocation11 + $0x50] sm:$0xff] }
  0xd2   : > { %1006 = vmatpush3.bf16.msra.mxu1 %v1005_v18  ;;  %v677_v33 = vld [vmem:[#allocation11 + $0x58] sm:$0xff]  ;;  %v679_v36 = vld [vmem:[#allocation11 + $0x68] sm:$0xff]  ;;  %v680_v38 = vld [vmem:[#allocation11 + $0x70] sm:$0xff] }
  0xd3   : > { %987 = vmatpush1.bf16.msra.mxu0 %v986_v25  ;;  %1007 = vmatprep.subr.bf16.mxu1 %v1403_v19  ;;  %v1011_v25 = vpack.c.bf16 %v671_v24, %v670_v23  ;;  %v1020_v34 = vpack.c.bf16 %v677_v33, %v676_v32  ;;  %v681_v39 = vld [vmem:[#allocation11 + $0x78] sm:$0xff] }
  0xd4   : > { %989 = vmatprep.subr.bf16.mxu0 %v988_v28  ;;  %v1014_v28 = vpack.c.bf16 %v673_v27, %v672_v26 }
  0xd6   : > { %1009 = vmatpush3.bf16.msra.mxu1 %v1008_v22 }
  0xd7   : > { %991 = vmatpush1.bf16.msra.mxu0 %v990_v31  ;;  %1010 = vmatprep.subr.bf16.mxu1 %v1403_v19  ;;  %v1017_v31 = vpack.c.bf16 %v675_v30, %v674_v29 }
  0xd8   : > { %993 = vmatprep.subr.bf16.mxu0 %v992_v35  ;;  %v678_v35 = vld [vmem:[#allocation11 + $0x60] sm:$0xff] }
  0xd9   : > { %v1023_v37 = vpack.c.bf16 %v679_v36, %v678_v35 }
  0xda   : > { %1012 = vmatpush3.bf16.msra.mxu1 %v1011_v25 }
  0xdb   : > { %995 = vmatpush1.bf16.msra.mxu0 %v994_v40  ;;  %1013 = vmatprep.subr.bf16.mxu1 %v1403_v19  ;;  %v1026_v40 = vpack.c.bf16 %v681_v39, %v680_v38 }
  0xdc   : > { %997 = vmatprep.subr.bf16.mxu0 %v996_v41 }
  0xde   : > { %1015 = vmatpush3.bf16.msra.mxu1 %v1014_v28 }
  0xdf   : > { %999 = vmatpush1.bf16.msra.mxu0 %v998_v46  ;;  %1016 = vmatprep.subr.bf16.mxu1 %v1403_v19 }
  0xe0   : > { %1001 = vmatprep.subr.bf16.mxu0 %v1000_v47 }
  0xe2   : > { %1018 = vmatpush3.bf16.msra.mxu1 %v1017_v31 }
  0xe3   : > { %1003 = vmatpush1.bf16.msra.mxu0 %v1002_v50  ;;  %1019 = vmatprep.subr.bf16.mxu1 %v1403_v19 }
  0xe6   : > { %1021 = vmatpush3.bf16.msra.mxu1 %v1020_v34 }
  0xe7   : > { %1022 = vmatprep.subr.bf16.mxu1 %v1403_v19 }
  0xea   : > { %1024 = vmatpush3.bf16.msra.mxu1 %v1023_v37 }
  0xeb   : > { %1025 = vmatprep.subr.bf16.mxu1 %v1403_v19 }
  0xee   : > { %1027 = vmatpush3.bf16.msra.mxu1 %v1026_v40 }
 0x150   : > { %v471_v51 = vpop.xlane.xlu0 %470 }
 0x151   : > { %v472_v52 = vmul.f32 0.03125, %v471_v51 }
 0x153   : > { %v477_v54 = vmul.f32 %v472_v52, %v472_v52  ;;  %v479_v58 = vsub.f32 %v1718_v0, %v472_v52  ;;  %v913_v52 = vld [vmem:[#allocation10] ss:$0 sm:$0xff] }
 0x154   : > { %v475_v53 = vpop.xlane.xlu0 %474 }
 0x155   : > { %v476_v55 = vmul.f32 0.03125, %v475_v53 }
 0x157   : > { %v478_v56 = vsub.f32 %v476_v55, %v477_v54  ;;  %v914_v54 = vld [vmem:[%s1809_s6] ss:$0 sm:$0xff] }
 0x159   : > { %v480_v57 = vadd.f32 1e-05, %v478_v56 }
 0x15b   : > { %1132 = vrsqrt.f32 %v480_v57 }
 0x165   : > { %v1133_v59 = vpop.eup %1132 }
 0x166   : > { %v482_v61 = vmul.f32 %v1133_v59, %v479_v58  ;;  %v655_v58 = vld [vmem:[%s1812_s9] sm:$0xff] }
 0x167   : > { %v657_v59 = vld [vmem:[%s1813_s10] sm:$0xff] }
 0x168   : > { %v490_v63 = vmul.f32 %v911_v60, %v482_v61 }
 0x16a   : > { %v498_v1 = vadd.f32 %v912_v62, %v490_v63 }
 0x16c   : > { %608 = vmatmul.mubr.f32.vlgmr.msra.gmra.mrb[0].mxu0 %v498_v1 }
 0x23f   : > { %v1734_v7 = vpop.f32.mrb[0].mxu0 }
 0x240   : > { %v611_v8 = vpop.f32.mrb[1].mxu0  ;;  %v610_v55 = vadd.f32 %v1734_v7, %v536_v49 }
 0x241   : > { %v612_v9 = vadd.f32 %v611_v8, %v540_v6 }
 0x242   : > { %v615_v60 = vmul.f32 0.70710677, %v610_v55  ;;  %v614_v7 = vmul.f32 0.5, %v610_v55 }
 0x243   : > { %v620_v10 = vmul.f32 0.70710677, %v612_v9  ;;  %v619_v12 = vmul.f32 0.5, %v612_v9 }
 0x245   : > { %1134 = verf.f32 %v620_v10 }
 0x24f   : > { %v1135_v11 = vpop.eup %1134 }
 0x250   : > { %v622_v13 = vadd.f32 1.0, %v1135_v11 }
 0x252   : > { %v623_v14 = vmul.f32 %v622_v13, %v619_v12  ;;  %v915_v13 = vld [vmem:[%s1811_s8] ss:$0 sm:$0xff] }
 0x254   : > { %624 = vadd.xlane.f32.xlu1 %v623_v14  ;;  %v627_v15 = vmul.f32 %v623_v14, %v623_v14 }
 0x258   : > { %628 = vadd.xlane.f32.xlu1 %v627_v15 }
 0x2e1   : > { %v625_v41 = vpop.xlane.xlu1 %624 }
 0x2e2   : > { %v626_v42 = vmul.f32 0.03125, %v625_v41 }
 0x2e4   : > { %v631_v44 = vmul.f32 %v626_v42, %v626_v42  ;;  %v633_v50 = vsub.f32 %v623_v14, %v626_v42 }
 0x2e5   : > { %v629_v43 = vpop.xlane.xlu1 %628 }
 0x2e6   : > { %v630_v45 = vmul.f32 0.03125, %v629_v43 }
 0x2e8   : > { %v632_v46 = vsub.f32 %v630_v45, %v631_v44 }
 0x2ea   : > { %v634_v47 = vadd.f32 1e-05, %v632_v46 }
 0x2ec   : > { %1136 = vrsqrt.f32 %v634_v47 }
 0x2ed   : > { %1138 = verf.f32 %v615_v60 }
 0x2f6   : > { %v1137_v51 = vpop.eup %1136 }
 0x2f7   : > { %v636_v53 = vmul.f32 %v1137_v51, %v633_v50  ;;  %v1139_v4 = vpop.eup %1138 }
 0x2f8   : > { %v617_v5 = vadd.f32 1.0, %v1139_v4 }
 0x2f9   : > { %v644_v56 = vmul.f32 %v913_v52, %v636_v53 }
 0x2fa   : > { %v618_v10 = vmul.f32 %v617_v5, %v614_v7 }
 0x2fb   : > { %v652_v57 = vadd.f32 %v914_v54, %v644_v56 }
 0x2fd   : > { %v653_v61 = vrot.slane %v652_v57, 7  ;;  %v654_v62 = vrot.slane %v652_v57, 1 }
 0x2ff   : > { %v656_v63 = vmul.f32 %v655_v58, %v653_v61  ;;  %v658_v1 = vmul.f32 %v657_v59, %v654_v62 }
 0x301   : > { %v659_v2 = vadd.f32 %v658_v1, %v656_v63 }
 0x303   : > { %v661_v3 = vmul.f32 0.70710677, %v659_v2  ;;  %v660_v8 = vmul.f32 0.5, %v659_v2 }
 0x305   : > { %1140 = verf.f32 %v661_v3 }
 0x30f   : > { %v1141_v6 = vpop.eup %1140 }
 0x310   : > { %v663_v9 = vadd.f32 1.0, %v1141_v6 }
 0x312   : > { %v664_v11 = vmul.f32 %v663_v9, %v660_v8 }
 0x314   : > { %v665_v12 = vmul.f32 %v664_v11, %v618_v10 }
 0x316   : > { %970 = vmatmul.mubr.f32.vlgmr.msra.gmra.mrb[0].mxu1 %v665_v12 }
 0x3e9   : > { %v755_v14 = vpop.f32.mrb[0].mxu1 }
 0x3ea   : > { %v756_v15 = vadd.f32 %v915_v13, %v755_v14  ;;  %v971_v16 = vpop.f32.mrb[1].mxu1 }
 0x3ec   : > { %v759_v17 = vadd.f32 %v756_v15, %v1718_v0 }
 0x3ee   : > { %760 = vst [vmem:[%s468_s24] sm:$0xff] %v759_v17 }
 0x3ef   : > { %1325 = shalt.err (!%p1322_p0)
}
 0x3f0   : > { %s1326_s2 = scalar_lea.hbm %s1759_s30, 128  ;;  %s1330_s24 = scalar_lea.hbm %s1839_s15, 256 }
 0x3f1   : > { %p1327_p6 = scmp.ne.s32.totalorder %s1759_s30, %s1326_s2  ;;  %p1331_p8 = scmp.lt.u32.totalorder %s1759_s30, %s1839_s15 }
 0x3f2   : > { %p1332_p5 = scmp.lt.u32.totalorder %s1330_s24, %s1326_s2  ;;  %p1334_p7 = scmp.lt.u32.totalorder %s1326_s2, %s1759_s30 }
 0x3f3   : > { %p1328_p11 = pnand %p1327_p6, %p1840_p10 }
 0x3f4   : > { %p1333_p9 = por %p1332_p5, %p1331_p8 }
 0x3f5   : > { %p1329_p12 = pneg %p1328_p11 }
 0x3f6   : > { %p1335_p4 = por %p1334_p7, %p1333_p9 }
 0x3f8   : > { %p1336_p13 = pnand %p1335_p4, %p1329_p12 }
 0x3fa   : > { %1339 = shalt.err (!%p1336_p13)
}
 0x3fb   : > { %1050 = dma.vmem_to_hbm [thread:$0]  (%p1840_p10), %s1761_s27, 128, %s1759_s30, %s762_s29  }
 0x3fc PF: > { %s787_s23 = sand.u32 1, %s1378_s17   ;;  %p1841_p1 = scmp.ne.s32.totalorder %s1830_s11, 0 }
 0x3fd   : > { %p1842_p3 = scmp.ge.s32.totalorder %s1390_s20, 2  ;;  %s788_s14 = scalar_lea.sflag [#allocation4], %s787_s23 }
 0x3ff   : > { %p1073_p2 = pnand %p1842_p3, %p1841_p1 }
 0x401   : > { %1373 = dma.done.wait (!%p1073_p2), %s788_s14, 128  }
 0x402   : > { %1375 = vsyncadd (!%p1073_p2), %s788_s14, 4294967168  ;;  %p27_p0 = scmp.ge.s32.totalorder %s1626_s25, 4   ;;  %s1843_s17 = smov %s1382_s18 }
 0x403   : > { %s1844_s18 = smov %s1386_s19  ;;  %s1845_s19 = smov %s1638_s22 }
 0x404   : > { %s1846_s20 = smov %s1626_s25  ;;  %29 = sbr.rel (!%p27_p0) target bundleno = 12 (0xc), region = 129 }
 0x40b   :  { %793 = vsyncpa [#allocation3], 1 }
 0x40c   :  { %795 = vsyncpa [#allocation3 + $0x1], 1 }
 0x40d   :  { %796 = vsyncpa [#allocation6], 1 }
 0x40e   :  { %797 = vsyncpa [#allocation9], 1 }
 0x40f   :  { %798 = vsyncpa [#allocation12], 1 }
 0x410   :  { %799 = vsyncpa [#allocation4], 1 }
 0x411   :  { %801 = vsyncpa [#allocation4 + $0x1], 1 }

</bundles_post_ra>
